<compile_context>
chip_gen: v7x
topology: tpu7x:2x2x1
jax: 0.10.0
libtpu: 0.0.40
codegen_flags: <defaults>
</compile_context>

<pallas_src>
import jax
import jax.numpy as jnp
from jax.experimental import pallas as pl
from jax.experimental.pallas import tpu as pltpu

_MAX_LANE = 1024              # preferred lane-dense last dim (multiple of 128)
_MIN_LANE = 128
_SMALL_INPUT_ELEMS = 1 << 20  # below this, plain fused XLA beats pallas_call overhead


def _get_mask_kernel(pad_ref, x_ref, o_ref):
    # pad_ref: (1,1) scalar in SMEM; x_ref / o_ref: (tr, lane) VMEM tiles.
    pad = pad_ref[0, 0]
    o_ref[...] = (x_ref[...].astype(pad_ref.dtype) != pad).astype(o_ref.dtype)


def _pick_lane(n):
    lane = _MAX_LANE
    while lane > _MIN_LANE and n % lane:
        lane //= 2
    return lane


def _tile_budget():
    """(elements per tile, vmem_limit_bytes) chosen per TPU generation."""
    try:
        kind = jax.devices()[0].device_kind.lower()
    except Exception:
        return 512 * 1024, None
    if "v5 lite" in kind or "v5lite" in kind or "v5e" in kind:
        # 2 MiB in + 2 MiB out, double-buffered = 8 MiB < 16 MiB scoped default.
        return 512 * 1024, None
    # v6e / v7x (and anything else): bigger tiles amortize per-step overhead.
    # 4 MiB in + 4 MiB out, double-buffered = 16 MiB -> raise scoped limit to 32 MiB
    # (fits v6e's 128 MiB and v7x's 64 MiB physical VMEM).
    return 1024 * 1024, 32 << 20


def _mask_2d(flat, pad_arr, out_dtype):
    """Pallas path for a 1-D array whose length is a multiple of 128."""
    n = flat.shape[0]
    lane = _pick_lane(n)
    rows = n // lane
    x2 = flat.reshape(rows, lane)

    tile_elems, vmem_limit = _tile_budget()
    target_rows = max(8, tile_elems // lane)      # always a multiple of 8
    if rows <= target_rows:
        tr = rows          # single block covering the full row dim (always legal)
    else:
        tr = target_rows   # multiple of 8; ragged row tail handled by cdiv grid
    grid = (pl.cdiv(rows, tr),)

    out2 = pl.pallas_call(
        _get_mask_kernel,
        out_shape=jax.ShapeDtypeStruct((rows, lane), out_dtype),
        grid=grid,
        in_specs=[
            pl.BlockSpec(memory_space=pltpu.MemorySpace.SMEM),   # pad scalar
            pl.BlockSpec((tr, lane), lambda i: (i, 0)),
        ],
        out_specs=pl.BlockSpec((tr, lane), lambda i: (i, 0)),
        # TODO(synk): on v7x, shard this axis across the 2 TensorCores
        # (pltpu.CORE_PARALLEL / pl.core_map), gated by generation detection.
        compiler_params=pltpu.CompilerParams(
            dimension_semantics=("arbitrary",),
            vmem_limit_bytes=vmem_limit,
        ),
    )(pad_arr, x2)
    return out2.reshape(-1)


def get_mask(x, pad_idx=0, *, out_dtype=jnp.float32,
             min_pallas_elems=_SMALL_INPUT_ELEMS):
    """mask = (x != pad_idx).astype(out_dtype) — elementwise, any input shape."""
    orig_shape = x.shape
    n = x.size
    if n == 0:
        return jnp.zeros(orig_shape, out_dtype)

    # Comparison dtype: exact for all common inputs (int token ids, f32/bf16 floats).
    if x.dtype.itemsize == 4:
        cmp_dtype = x.dtype
    elif jnp.issubdtype(x.dtype, jnp.floating):
        cmp_dtype = jnp.float32
    else:
        cmp_dtype = jnp.int32
    pad_val = jnp.asarray(pad_idx).astype(cmp_dtype)

    n_main = (n // _MIN_LANE) * _MIN_LANE
    if n < min_pallas_elems or n_main == 0:
        # Small-input fast path: single fused XLA elementwise pass.
        return (x.astype(cmp_dtype) != pad_val).astype(out_dtype)

    pad_arr = pad_val.reshape(1, 1)
    flat = x.reshape(-1)
    if n_main == n:
        out = _mask_2d(flat, pad_arr, out_dtype)
    else:
        # Ragged remainder (< 128 elems): tiny fused-XLA tail; no full-array pad/slice.
        main = _mask_2d(flat[:n_main], pad_arr, out_dtype)
        tail = (flat[n_main:].astype(cmp_dtype) != pad_val).astype(out_dtype)
        out = jnp.concatenate([main, tail])
    return out.reshape(orig_shape)


if __name__ == "__main__":
    key = jax.random.PRNGKey(0)
    k1, k2, k3, k4 = jax.random.split(key, 4)

    # Case 1: token-id batch [8, 128] — force the Pallas path (single full block).
    x1 = jax.random.randint(k1, (8, 128), 0, 5, dtype=jnp.int32)
    m1 = get_mask(x1, pad_idx=0, min_pallas_elems=0)
    jax.block_until_ready(m1)
    assert m1.shape == x1.shape and m1.dtype == jnp.float32
    assert bool(jnp.all(m1 == (x1 != 0).astype(jnp.float32)))

    # Case 2: ragged arbitrary-rank input — Pallas bulk + tiny fused-XLA tail.
    x2 = jax.random.randint(k2, (2, 7, 33), 0, 3, dtype=jnp.int32)
    m2 = get_mask(x2, pad_idx=1, min_pallas_elems=0)
    jax.block_until_ready(m2)
    assert m2.shape == x2.shape and m2.dtype == jnp.float32
    assert bool(jnp.all(m2 == (x2 != 1).astype(jnp.float32)))

    # Case 3: [1100, 1024] — exceeds the default small-input threshold, exercises the
    # non-divisible row grid (cdiv) with no padding and no output slice.
    x3 = jax.random.randint(k3, (1100, 1024), 0, 4, dtype=jnp.int32)
    m3 = get_mask(x3, pad_idx=2)
    jax.block_until_ready(m3)
    assert m3.shape == x3.shape and m3.dtype == jnp.float32
    assert bool(jnp.all(m3 == (x3 != 2).astype(jnp.float32)))

    # Case 4: small float input, default threshold — fused-XLA fast path.
    x4 = jnp.where(jax.random.uniform(k4, (4, 50)) < 0.3, 0.0, 1.5)
    m4 = get_mask(x4, pad_idx=0)
    jax.block_until_ready(m4)
    assert bool(jnp.all(m4 == (x4 != 0.0).astype(jnp.float32)))

    print("KERNEL_OK")
</pallas_src>

<mosaic_0001>
module attributes {stable_mosaic.version = 11 : i64} {
  func.func @_get_mask_kernel(%arg0: i32, %arg1: memref<1x1xi32, #tpu.memory_space<smem>>, %arg2: memref<1x1024xi32, #tpu.memory_space<vmem>>, %arg3: memref<1x1024xf32, #tpu.memory_space<vmem>>) attributes {dimension_semantics = [#tpu.dimension_semantics<arbitrary>], iteration_bounds = array<i64: 1>, scalar_prefetch = 0 : i64, scratch_operands = 0 : i64, tpu.core_type = #tpu.core_type<tc>, window_params = [{transform_indices = @transform_0, window_bounds = array<i64: 1, 1>}, {transform_indices = @transform_1, window_bounds = array<i64: 1, 1024>}, {transform_indices = @transform_2, window_bounds = array<i64: 1, 1024>}]} {
    %c0 = arith.constant 0 : index
    %c0_0 = arith.constant 0 : index
    %0 = memref.load %arg1[%c0, %c0_0] : memref<1x1xi32, #tpu.memory_space<smem>>
    %c0_1 = arith.constant 0 : index
    %c0_2 = arith.constant 0 : index
    %1 = vector.load %arg2[%c0_1, %c0_2] : memref<1x1024xi32, #tpu.memory_space<vmem>>, vector<1x1024xi32>
    %2 = vector.broadcast %0 : i32 to vector<1x1024xi32>
    %3 = arith.cmpi ne, %1, %2 : vector<1x1024xi32>
    %4 = arith.extui %3 : vector<1x1024xi1> to vector<1x1024xi32>
    %5 = arith.sitofp %4 : vector<1x1024xi32> to vector<1x1024xf32>
    %c0_3 = arith.constant 0 : index
    %c0_4 = arith.constant 0 : index
    %6 = vector.load %arg3[%c0_3, %c0_4] : memref<1x1024xf32, #tpu.memory_space<vmem>>, vector<1x1024xf32>
    tpu.vector_store %arg3[%c0_3, %c0_4], %5 {strides = array<i32>} : memref<1x1024xf32, #tpu.memory_space<vmem>>, vector<1x1024xf32>,
    return
  }
  func.func @transform_0(%arg0: i32) -> (i32, i32) {
    %c0_i32 = arith.constant 0 : i32
    %c0_i32_0 = arith.constant 0 : i32
    %c0_i32_1 = arith.constant 0 : i32
    return %c0_i32, %c0_i32_0 : i32, i32
  }
  func.func @transform_1(%arg0: i32) -> (i32, i32) {
    %c0_i32 = arith.constant 0 : i32
    %c0_i32_0 = arith.constant 0 : i32
    return %arg0, %c0_i32 : i32, i32
  }
  func.func @transform_2(%arg0: i32) -> (i32, i32) {
    %c0_i32 = arith.constant 0 : i32
    %c0_i32_0 = arith.constant 0 : i32
    return %arg0, %c0_i32 : i32, i32
  }
}

</mosaic_0001>

<bundles_post_ra>
// kernel: tpu_custom_call.1
= control target key start
LH: loop header
LB: loop body
LE: loop exit
PB: predicated region body
PF: predicated region fallthrough
CT: control target
= control target key end

     0   :  { %8 = vsyncpa [#allocation4], 0  ;;  %s144_s0 = inlined_call_operand.<no memory space> [shape: s32[1,1], index: 0, kind: input, shape index: {}]   ;;  %s145_s1 = inlined_call_operand.hbm [shape: s32[1,1024], index: 1, kind: input, shape index: {}]   ;;  %s146_s2 = inlined_call_operand.hbm [shape: f32[1,1024], index: 2, kind: output, shape index: {}]  }
   0x1   :  { %9 = vsyncpa [#allocation5], 0  ;;  %s99_s9 = smov [#allocation3]   ;;  %s51_s13 = scalar_lea.hbm %s145_s1, 128 }
   0x2   :  { %s18_s10 = sshll.u32 %s99_s9, 4  ;;  %p52_p0 = scmp.ne.s32.totalorder %s145_s1, %s51_s13  ;;  %s19_s10 = int_to_ptr.vmem [resolvable:$true] %s18_s10 }
   0x3   :  { %p55_p1 = scmp.lt.u32.totalorder %s51_s13, %s145_s1 }
   0x5   :  { %p57_p2 = pnand %p55_p1, %p52_p0 }
   0x7   :  { %60 = shalt.err (!%p57_p2)
}
   0x8   :  { %s61_s18 = scalar_lea.vmem %s19_s10, 128  ;;  %p66_p4 = scmp.lt.s32.totalorder %s19_s10, %s19_s10 }
   0x9   :  { %p62_p3 = scmp.ne.s32.totalorder %s19_s10, %s61_s18  ;;  %p67_p5 = scmp.lt.s32.totalorder %s61_s18, %s61_s18 }
   0xb   :  { %p68_p6 = por %p67_p5, %p66_p4 }
   0xd   :  { %p69_p7 = pnand %p68_p6, %p62_p3 }
   0xf   :  { %72 = shalt.err (!%p69_p7)
}
  0x10   :  { %21 = dma.hbm_to_vmem [thread:$0]  %s145_s1, 128, %s19_s10, [#allocation4]  }
  0x11   :  { %95 = dma.done.wait [#allocation4], 128  }
  0x12   :  { %96 = vsyncadd [#allocation4], 4294967168  ;;  %v27_v0 = vstv %s144_s0  ;;  %s100_s23 = smov [#allocation6]   ;;  %v26_v1 = vld [vmem:[#allocation3] sm:$0xff]  ;;  %v101_v2 = vmov 0.0  }
  0x13   :  { %s38_s24 = sshll.u32 %s100_s23, 4  ;;  %vm28_vm0 = vcmp.ne.s32.totalorder %v26_v1, %v27_v0  ;;  %s39_s24 = int_to_ptr.vmem [resolvable:$true] %s38_s24 }
  0x14   :  { %v47_v3 = vsel %vm28_vm0, 1.0, %v101_v2  ;;  %s73_s25 = scalar_lea.vmem %s39_s24, 128  ;;  %p78_p9 = scmp.lt.s32.totalorder %s39_s24, %s39_s24 }
  0x15   :  { %31 = vst [vmem:[#allocation6] sm:$0xff] %v47_v3  ;;  %p74_p8 = scmp.ne.s32.totalorder %s39_s24, %s73_s25  ;;  %p79_p10 = scmp.lt.s32.totalorder %s73_s25, %s73_s25 }
  0x17   :  { %p80_p11 = por %p79_p10, %p78_p9 }
  0x19   :  { %p81_p12 = pnand %p80_p11, %p74_p8 }
  0x1b   :  { %84 = shalt.err (!%p81_p12)
}
  0x1c   :  { %s85_s27 = scalar_lea.hbm %s146_s2, 128 }
  0x1d   :  { %p86_p13 = scmp.ne.s32.totalorder %s146_s2, %s85_s27  ;;  %p89_p0 = scmp.lt.u32.totalorder %s85_s27, %s146_s2 }
  0x1f   :  { %p91_p1 = pnand %p89_p0, %p86_p13 }
  0x21   :  { %94 = shalt.err (!%p91_p1)
}
  0x22   :  { %41 = dma.vmem_to_hbm [thread:$0]  %s39_s24, 128, %s146_s2, [#allocation5]  }
  0x23   :  { %97 = dma.done.wait [#allocation5], 128  }
  0x24   :  { %98 = vsyncadd [#allocation5], 4294967168 }
  0x25   :  { %45 = vsyncpa [#allocation4], 1 }
  0x26   :  { %46 = vsyncpa [#allocation5], 1 }

</bundles_post_ra>
